<compile_context>
chip_gen: v7x
topology: tpu7x:2x2x1
jax: 0.10.0
libtpu: 0.0.40
codegen_flags: <defaults>
</compile_context>

<pallas_src>
import numpy as np
import jax
import jax.numpy as jnp
from jax.experimental import pallas as pl
from jax.experimental.pallas import tpu as pltpu

N, H, W, C = 2, 16, 16, 8          # batch, height, width, channels (in == out)
GROUPS = 4
CPG = C // GROUPS                  # channels per group
WC = W * C                         # 128: lane-dense activation width
NH = N * H                         # 32 : both samples stacked along sublanes
EPS = 1e-5                         # PyTorch GroupNorm default eps
INV_GROUP_N = 1.0 / float(H * W * CPG)   # elements per GroupNorm group


# --------------------------------- kernel ------------------------------------

def resnet_block_kernel(x_ref, w1_ref, w2_ref, p_ref, gm_ref, out_ref):
    x = x_ref[...]                     # (NH, WC) lane-dense, both samples stacked
    p = p_ref[...]                     # (8, WC): b1, g1, be1, b2, g2, be2, 0, 0
    gmat = gm_ref[...]                 # (WC, WC) 0/1 group-membership matrix

    b1, g1, be1 = p[0:1], p[1:2], p[2:3]
    b2, g2, be2 = p[3:4], p[4:5], p[5:6]

    # Masks that zero the vertical-tap rows that wrap around the array or leak
    # across the sample boundary (rows 0/16 for the "up" neighbour, 15/31 for
    # the "down" neighbour).  Computed once, reused by both convs.
    row = jax.lax.broadcasted_iota(jnp.int32, (NH, WC), 0) % H
    top_ok = (row != 0).astype(jnp.float32)
    bot_ok = (row != H - 1).astype(jnp.float32)

    def conv3x3(h, w_ref, bias):
        # 3x3 'same' conv = 3 lane-dense (NH,128)@(128,128) MXU matmuls.
        # Horizontal padding is baked into the Toeplitz slabs; vertical taps come
        # from XLU sublane rolls (no scratch store->load round trip).
        h_dn = pltpu.roll(h, 1, 0) * top_ok          # row m <- h[m-1]
        h_up = pltpu.roll(h, NH - 1, 0) * bot_ok     # row m <- h[m+1]
        acc = jnp.dot(h_dn, w_ref[0], preferred_element_type=jnp.float32)
        acc = acc + jnp.dot(h, w_ref[1], preferred_element_type=jnp.float32)
        acc = acc + jnp.dot(h_up, w_ref[2], preferred_element_type=jnp.float32)
        return acc + bias

    def group_norm(h, gamma, beta):
        # Sublane-reduce each sample first (sum and sum-of-squares -> 2N rows),
        # then ONE tiny (2N,128)@(128,128) matmul folds lanes within each group.
        stats = []
        for n in range(N):
            hs = h[n * H:(n + 1) * H]
            stats.append(jnp.sum(hs, axis=0, keepdims=True))
            stats.append(jnp.sum(hs * hs, axis=0, keepdims=True))
        g = jnp.dot(jnp.concatenate(stats, axis=0), gmat,
                    preferred_element_type=jnp.float32) * INV_GROUP_N
        parts = []
        for n in range(N):
            mean = g[2 * n:2 * n + 1]
            var = g[2 * n + 1:2 * n + 2] - mean * mean       # biased (PyTorch)
            scale = gamma * jax.lax.rsqrt(var + EPS)
            shift = beta - mean * scale
            parts.append(h[n * H:(n + 1) * H] * scale + shift)
        return jnp.concatenate(parts, axis=0)

    # conv1 -> GroupNorm -> ReLU
    h = conv3x3(x, w1_ref, b1)
    h = jnp.maximum(group_norm(h, g1, be1), 0.0)

    # conv2 -> GroupNorm
    h = conv3x3(h, w2_ref, b2)
    h = group_norm(h, g2, be2)

    # residual add + ReLU, lane-dense (NH, WC) unmasked store
    out_ref[...] = jnp.maximum(x + h, 0.0)


# ------------------------------ wrapper helpers --------------------------------

def _expand_conv_weight(w):
    """(9, Cin, Cout) 3x3 taps -> (3, W*C, W*C) block-Toeplitz slabs.

    One slab per kernel row dy; the horizontal zero-padding is folded in by
    simply omitting out-of-range input columns, so K == W*C == 128 (MXU aligned).
    """
    w = np.asarray(w, np.float32).reshape(3, 3, C, C)
    r = np.zeros((3, WC, WC), np.float32)
    for dy in range(3):
        for dx in range(3):
            for xo in range(W):
                xi = xo + dx - 1
                if 0 <= xi < W:
                    r[dy, xi * C:(xi + 1) * C, xo * C:(xo + 1) * C] = w[dy, dx]
    return jnp.asarray(r)


def _group_matrix():
    gid = (np.arange(WC) % C) // CPG
    return jnp.asarray((gid[:, None] == gid[None, :]).astype(np.float32))


def _pack_params(b1, g1, be1, b2, g2, be2):
    """Six per-channel (1, C) vectors -> one (8, W*C) slab, tiled across W."""
    rows = [np.tile(np.asarray(v, np.float32).reshape(C), W)
            for v in (b1, g1, be1, b2, g2, be2)]
    rows += [np.zeros(WC, np.float32), np.zeros(WC, np.float32)]
    return jnp.asarray(np.stack(rows, axis=0))


# -------------------------------- wrapper --------------------------------------

def resnet_block(x, w1, b1, g1, be1, w2, b2, g2, be2):
    x2 = x.reshape(NH, WC)                       # lane-dense view (free in XLA)
    args = (x2,
            _expand_conv_weight(w1),
            _expand_conv_weight(w2),
            _pack_params(b1, g1, be1, b2, g2, be2),
            _group_matrix())

    out = pl.pallas_call(
        resnet_block_kernel,
        out_shape=jax.ShapeDtypeStruct((NH, WC), jnp.float32),
        grid_spec=pltpu.PrefetchScalarGridSpec(
            num_scalar_prefetch=0,
            grid=(1,),                                               # whole batch in one step
            in_specs=[
                pl.BlockSpec((NH, WC), lambda i: (0, 0)),            # x (lane-dense)
                pl.BlockSpec((3, WC, WC), lambda i: (0, 0, 0)),      # conv1 Toeplitz slabs
                pl.BlockSpec((3, WC, WC), lambda i: (0, 0, 0)),      # conv2 Toeplitz slabs
                pl.BlockSpec((8, WC), lambda i: (0, 0)),             # packed per-channel params
                pl.BlockSpec((WC, WC), lambda i: (0, 0)),            # group membership matrix
            ],
            out_specs=pl.BlockSpec((NH, WC), lambda i: (0, 0)),      # lane-dense out
        ),
        compiler_params=pltpu.CompilerParams(dimension_semantics=("arbitrary",)),
    )(*args)
    return out.reshape(N, H, W, C)


# ------------------------------ pure-JAX reference -----------------------------

def reference(x, w1, b1, g1, be1, w2, b2, g2, be2):
    def conv(t, w, b):
        y = jax.lax.conv_general_dilated(
            t, w.reshape(3, 3, C, C), (1, 1), 'SAME',
            dimension_numbers=('NHWC', 'HWIO', 'NHWC'))
        return y + b.reshape(1, 1, 1, C)

    def gn(t, gamma, beta):
        n, h, w, c = t.shape
        tr = t.reshape(n, h, w, GROUPS, c // GROUPS)
        mean = tr.mean(axis=(1, 2, 4), keepdims=True)
        var = ((tr - mean) ** 2).mean(axis=(1, 2, 4), keepdims=True)
        tr = (tr - mean) * jax.lax.rsqrt(var + EPS)
        return tr.reshape(n, h, w, c) * gamma.reshape(1, 1, 1, c) + beta.reshape(1, 1, 1, c)

    h = jax.nn.relu(gn(conv(x, w1, b1), g1, be1))
    h = gn(conv(h, w2, b2), g2, be2)
    return jax.nn.relu(x + h)


# ---------------------------------- main ---------------------------------------

if __name__ == "__main__":
    key = jax.random.PRNGKey(0)
    ks = jax.random.split(key, 9)
    x = jax.random.normal(ks[0], (N, H, W, C), jnp.float32)

    # deterministic synthetic parameters (shapes match nn.Conv2d / GroupNorm)
    w1 = 0.1 * jax.random.normal(ks[1], (9, C, C), jnp.float32)
    b1 = 0.1 * jax.random.normal(ks[2], (1, C), jnp.float32)
    g1 = 1.0 + 0.1 * jax.random.normal(ks[3], (1, C), jnp.float32)
    be1 = 0.1 * jax.random.normal(ks[4], (1, C), jnp.float32)
    w2 = 0.1 * jax.random.normal(ks[5], (9, C, C), jnp.float32)
    b2 = 0.1 * jax.random.normal(ks[6], (1, C), jnp.float32)
    g2 = 1.0 + 0.1 * jax.random.normal(ks[7], (1, C), jnp.float32)
    be2 = 0.1 * jax.random.normal(ks[8], (1, C), jnp.float32)

    out = resnet_block(x, w1, b1, g1, be1, w2, b2, g2, be2)
    jax.block_until_ready(out)

    ref = reference(x, w1, b1, g1, be1, w2, b2, g2, be2)
    assert jnp.allclose(out, ref, atol=2e-3, rtol=2e-3), float(jnp.max(jnp.abs(out - ref)))

    print("KERNEL_OK")
</pallas_src>

<mosaic_0001>
module attributes {stable_mosaic.version = 11 : i64} {
  func.func @resnet_block_kernel(%arg0: i32, %arg1: memref<32x128xf32, #tpu.memory_space<vmem>>, %arg2: memref<3x128x128xf32, #tpu.memory_space<vmem>>, %arg3: memref<3x128x128xf32, #tpu.memory_space<vmem>>, %arg4: memref<8x128xf32, #tpu.memory_space<vmem>>, %arg5: memref<128x128xf32, #tpu.memory_space<vmem>>, %arg6: memref<32x128xf32, #tpu.memory_space<vmem>>) attributes {dimension_semantics = [#tpu.dimension_semantics<arbitrary>], iteration_bounds = array<i64: 1>, scalar_prefetch = 0 : i64, scratch_operands = 0 : i64, tpu.core_type = #tpu.core_type<tc>, window_params = [{pipeline_mode = #tpu.pipeline_mode<synchronous>, transform_indices = @transform_0, window_bounds = array<i64: 32, 128>}, {pipeline_mode = #tpu.pipeline_mode<synchronous>, transform_indices = @transform_1, window_bounds = array<i64: 3, 128, 128>}, {pipeline_mode = #tpu.pipeline_mode<synchronous>, transform_indices = @transform_2, window_bounds = array<i64: 3, 128, 128>}, {pipeline_mode = #tpu.pipeline_mode<synchronous>, transform_indices = @transform_3, window_bounds = array<i64: 8, 128>}, {pipeline_mode = #tpu.pipeline_mode<synchronous>, transform_indices = @transform_4, window_bounds = array<i64: 128, 128>}, {pipeline_mode = #tpu.pipeline_mode<synchronous>, transform_indices = @transform_5, window_bounds = array<i64: 32, 128>}]} {
    %c0 = arith.constant 0 : index
    %c0_0 = arith.constant 0 : index
    %0 = vector.load %arg1[%c0, %c0_0] : memref<32x128xf32, #tpu.memory_space<vmem>>, vector<32x128xf32>
    %c0_1 = arith.constant 0 : index
    %c0_2 = arith.constant 0 : index
    %1 = vector.load %arg4[%c0_1, %c0_2] : memref<8x128xf32, #tpu.memory_space<vmem>>, vector<8x128xf32>
    %c0_3 = arith.constant 0 : index
    %c0_4 = arith.constant 0 : index
    %2 = vector.load %arg5[%c0_3, %c0_4] : memref<128x128xf32, #tpu.memory_space<vmem>>, vector<128x128xf32>
    %3 = vector.extract_strided_slice %1 {offsets = [0, 0], sizes = [1, 128], strides = [1, 1]} : vector<8x128xf32> to vector<1x128xf32>
    %4 = vector.extract_strided_slice %1 {offsets = [1, 0], sizes = [1, 128], strides = [1, 1]} : vector<8x128xf32> to vector<1x128xf32>
    %5 = vector.extract_strided_slice %1 {offsets = [2, 0], sizes = [1, 128], strides = [1, 1]} : vector<8x128xf32> to vector<1x128xf32>
    %6 = vector.extract_strided_slice %1 {offsets = [3, 0], sizes = [1, 128], strides = [1, 1]} : vector<8x128xf32> to vector<1x128xf32>
    %7 = vector.extract_strided_slice %1 {offsets = [4, 0], sizes = [1, 128], strides = [1, 1]} : vector<8x128xf32> to vector<1x128xf32>
    %8 = vector.extract_strided_slice %1 {offsets = [5, 0], sizes = [1, 128], strides = [1, 1]} : vector<8x128xf32> to vector<1x128xf32>
    %9 = tpu.iota {dimensions = array<i32: 0>} : vector<32x128xi32>
    %c16_i32 = arith.constant 16 : i32
    %c0_i32 = arith.constant 0 : i32
    %10 = arith.cmpi eq, %c16_i32, %c0_i32 : i32
    %c1_i32 = arith.constant 1 : i32
    %11 = arith.select %10, %c1_i32, %c16_i32 : i32
    %12 = vector.broadcast %11 : i32 to vector<32x128xi32>
    %13 = arith.remsi %9, %12 : vector<32x128xi32>
    %c0_i32_5 = arith.constant 0 : i32
    %14 = vector.broadcast %c0_i32_5 : i32 to vector<32x128xi32>
    %15 = arith.cmpi ne, %13, %14 : vector<32x128xi32>
    %c0_i32_6 = arith.constant 0 : i32
    %16 = vector.broadcast %c0_i32_6 : i32 to vector<32x128xi32>
    %17 = arith.cmpi slt, %13, %16 : vector<32x128xi32>
    %c0_i32_7 = arith.constant 0 : i32
    %18 = arith.cmpi slt, %11, %c0_i32_7 : i32
    %19 = vector.broadcast %18 : i1 to vector<32x128xi1>
    %20 = vector.broadcast %19 : vector<32x128xi1> to vector<32x128xi1>
    %21 = arith.xori %17, %20 : vector<32x128xi1>
    %22 = arith.andi %21, %15 : vector<32x128xi1>
    %23 = vector.broadcast %11 : i32 to vector<32x128xi32>
    %24 = arith.addi %13, %23 : vector<32x128xi32>
    %25 = arith.select %22, %24, %13 : vector<32x128xi1>, vector<32x128xi32>
    %c0_i32_8 = arith.constant 0 : i32
    %26 = vector.broadcast %c0_i32_8 : i32 to vector<32x128xi32>
    %27 = arith.cmpi ne, %25, %26 : vector<32x128xi32>
    %28 = arith.extui %27 : vector<32x128xi1> to vector<32x128xi32>
    %29 = arith.sitofp %28 : vector<32x128xi32> to vector<32x128xf32>
    %c15_i32 = arith.constant 15 : i32
    %30 = vector.broadcast %c15_i32 : i32 to vector<32x128xi32>
    %31 = arith.cmpi ne, %25, %30 : vector<32x128xi32>
    %32 = arith.extui %31 : vector<32x128xi1> to vector<32x128xi32>
    %33 = arith.sitofp %32 : vector<32x128xi32> to vector<32x128xf32>
    %c1_i32_9 = arith.constant 1 : i32
    %34 = tpu.dynamic_rotate %0 by %c1_i32_9 dim 0 : vector<32x128xf32>, i32 -> vector<32x128xf32>
    %35 = arith.mulf %34, %29 : vector<32x128xf32>
    %c31_i32 = arith.constant 31 : i32
    %36 = tpu.dynamic_rotate %0 by %c31_i32 dim 0 : vector<32x128xf32>, i32 -> vector<32x128xf32>
    %37 = arith.mulf %36, %33 : vector<32x128xf32>
    %c0_10 = arith.constant 0 : index
    %c0_11 = arith.constant 0 : index
    %c0_12 = arith.constant 0 : index
    %38 = vector.load %arg2[%c0_10, %c0_11, %c0_12] : memref<3x128x128xf32, #tpu.memory_space<vmem>>, vector<1x128x128xf32>
    %39 = vector.shape_cast %38 : vector<1x128x128xf32> to vector<128x128xf32>
    %cst = arith.constant dense<0.000000e+00> : vector<32x128xf32>
    %40 = tpu.matmul %35, %39, %cst {dimension_numbers = #tpu.dot_dimension_numbers<[1], [0], [0], [1], [0, 0, 1, 1], [], []>} : vector<32x128xf32>, vector<128x128xf32>, vector<32x128xf32> -> vector<32x128xf32>
    %c1 = arith.constant 1 : index
    %c0_13 = arith.constant 0 : index
    %c0_14 = arith.constant 0 : index
    %41 = vector.load %arg2[%c1, %c0_13, %c0_14] : memref<3x128x128xf32, #tpu.memory_space<vmem>>, vector<1x128x128xf32>
    %42 = vector.shape_cast %41 : vector<1x128x128xf32> to vector<128x128xf32>
    %cst_15 = arith.constant dense<0.000000e+00> : vector<32x128xf32>
    %43 = tpu.matmul %0, %42, %cst_15 {dimension_numbers = #tpu.dot_dimension_numbers<[1], [0], [0], [1], [0, 0, 1, 1], [], []>} : vector<32x128xf32>, vector<128x128xf32>, vector<32x128xf32> -> vector<32x128xf32>
    %44 = arith.addf %40, %43 : vector<32x128xf32>
    %c2 = arith.constant 2 : index
    %c0_16 = arith.constant 0 : index
    %c0_17 = arith.constant 0 : index
    %45 = vector.load %arg2[%c2, %c0_16, %c0_17] : memref<3x128x128xf32, #tpu.memory_space<vmem>>, vector<1x128x128xf32>
    %46 = vector.shape_cast %45 : vector<1x128x128xf32> to vector<128x128xf32>
    %cst_18 = arith.constant dense<0.000000e+00> : vector<32x128xf32>
    %47 = tpu.matmul %37, %46, %cst_18 {dimension_numbers = #tpu.dot_dimension_numbers<[1], [0], [0], [1], [0, 0, 1, 1], [], []>} : vector<32x128xf32>, vector<128x128xf32>, vector<32x128xf32> -> vector<32x128xf32>
    %48 = arith.addf %44, %47 : vector<32x128xf32>
    %49 = vector.broadcast %3 : vector<1x128xf32> to vector<32x128xf32>
    %50 = arith.addf %48, %49 : vector<32x128xf32>
    %51 = vector.extract_strided_slice %50 {offsets = [0, 0], sizes = [16, 128], strides = [1, 1]} : vector<32x128xf32> to vector<16x128xf32>
    %cst_19 = arith.constant dense<0.000000e+00> : vector<128xf32>
    %52 = vector.multi_reduction <add>, %51, %cst_19 [0] : vector<16x128xf32> to vector<128xf32>
    %53 = vector.shape_cast %52 : vector<128xf32> to vector<1x128xf32>
    %54 = arith.mulf %51, %51 : vector<16x128xf32>
    %cst_20 = arith.constant dense<0.000000e+00> : vector<128xf32>
    %55 = vector.multi_reduction <add>, %54, %cst_20 [0] : vector<16x128xf32> to vector<128xf32>
    %56 = vector.shape_cast %55 : vector<128xf32> to vector<1x128xf32>
    %57 = vector.extract_strided_slice %50 {offsets = [16, 0], sizes = [16, 128], strides = [1, 1]} : vector<32x128xf32> to vector<16x128xf32>
    %cst_21 = arith.constant dense<0.000000e+00> : vector<128xf32>
    %58 = vector.multi_reduction <add>, %57, %cst_21 [0] : vector<16x128xf32> to vector<128xf32>
    %59 = vector.shape_cast %58 : vector<128xf32> to vector<1x128xf32>
    %60 = arith.mulf %57, %57 : vector<16x128xf32>
    %cst_22 = arith.constant dense<0.000000e+00> : vector<128xf32>
    %61 = vector.multi_reduction <add>, %60, %cst_22 [0] : vector<16x128xf32> to vector<128xf32>
    %62 = vector.shape_cast %61 : vector<128xf32> to vector<1x128xf32>
    %63 = tpu.concatenate %53, %56, %59, %62 in 0 : vector<1x128xf32>, vector<1x128xf32>, vector<1x128xf32>, vector<1x128xf32> -> vector<4x128xf32>
    %cst_23 = arith.constant dense<0.000000e+00> : vector<4x128xf32>
    %64 = tpu.matmul %63, %2, %cst_23 {dimension_numbers = #tpu.dot_dimension_numbers<[1], [0], [0], [1], [0, 0, 1, 1], [], []>} : vector<4x128xf32>, vector<128x128xf32>, vector<4x128xf32> -> vector<4x128xf32>
    %cst_24 = arith.constant 0.001953125 : f32
    %65 = vector.broadcast %cst_24 : f32 to vector<4x128xf32>
    %66 = arith.mulf %64, %65 : vector<4x128xf32>
    %67 = vector.extract_strided_slice %66 {offsets = [0, 0], sizes = [1, 128], strides = [1, 1]} : vector<4x128xf32> to vector<1x128xf32>
    %68 = vector.extract_strided_slice %66 {offsets = [1, 0], sizes = [1, 128], strides = [1, 1]} : vector<4x128xf32> to vector<1x128xf32>
    %69 = arith.mulf %67, %67 : vector<1x128xf32>
    %70 = arith.subf %68, %69 : vector<1x128xf32>
    %cst_25 = arith.constant 9.99999974E-6 : f32
    %71 = vector.broadcast %cst_25 : f32 to vector<1x128xf32>
    %72 = arith.addf %70, %71 : vector<1x128xf32>
    %73 = math.rsqrt %72 : vector<1x128xf32>
    %74 = arith.mulf %4, %73 : vector<1x128xf32>
    %75 = arith.mulf %67, %74 : vector<1x128xf32>
    %76 = arith.subf %5, %75 : vector<1x128xf32>
    %77 = vector.extract_strided_slice %50 {offsets = [0, 0], sizes = [16, 128], strides = [1, 1]} : vector<32x128xf32> to vector<16x128xf32>
    %78 = vector.broadcast %74 : vector<1x128xf32> to vector<16x128xf32>
    %79 = arith.mulf %77, %78 : vector<16x128xf32>
    %80 = vector.broadcast %76 : vector<1x128xf32> to vector<16x128xf32>
    %81 = arith.addf %79, %80 : vector<16x128xf32>
    %82 = vector.extract_strided_slice %66 {offsets = [2, 0], sizes = [1, 128], strides = [1, 1]} : vector<4x128xf32> to vector<1x128xf32>
    %83 = vector.extract_strided_slice %66 {offsets = [3, 0], sizes = [1, 128], strides = [1, 1]} : vector<4x128xf32> to vector<1x128xf32>
    %84 = arith.mulf %82, %82 : vector<1x128xf32>
    %85 = arith.subf %83, %84 : vector<1x128xf32>
    %cst_26 = arith.constant 9.99999974E-6 : f32
    %86 = vector.broadcast %cst_26 : f32 to vector<1x128xf32>
    %87 = arith.addf %85, %86 : vector<1x128xf32>
    %88 = math.rsqrt %87 : vector<1x128xf32>
    %89 = arith.mulf %4, %88 : vector<1x128xf32>
    %90 = arith.mulf %82, %89 : vector<1x128xf32>
    %91 = arith.subf %5, %90 : vector<1x128xf32>
    %92 = vector.extract_strided_slice %50 {offsets = [16, 0], sizes = [16, 128], strides = [1, 1]} : vector<32x128xf32> to vector<16x128xf32>
    %93 = vector.broadcast %89 : vector<1x128xf32> to vector<16x128xf32>
    %94 = arith.mulf %92, %93 : vector<16x128xf32>
    %95 = vector.broadcast %91 : vector<1x128xf32> to vector<16x128xf32>
    %96 = arith.addf %94, %95 : vector<16x128xf32>
    %97 = tpu.concatenate %81, %96 in 0 : vector<16x128xf32>, vector<16x128xf32> -> vector<32x128xf32>
    %cst_27 = arith.constant 0.000000e+00 : f32
    %98 = vector.broadcast %cst_27 : f32 to vector<32x128xf32>
    %99 = arith.maximumf %97, %98 : vector<32x128xf32>
    %c1_i32_28 = arith.constant 1 : i32
    %100 = tpu.dynamic_rotate %99 by %c1_i32_28 dim 0 : vector<32x128xf32>, i32 -> vector<32x128xf32>
    %101 = arith.mulf %100, %29 : vector<32x128xf32>
    %c31_i32_29 = arith.constant 31 : i32
    %102 = tpu.dynamic_rotate %99 by %c31_i32_29 dim 0 : vector<32x128xf32>, i32 -> vector<32x128xf32>
    %103 = arith.mulf %102, %33 : vector<32x128xf32>
    %c0_30 = arith.constant 0 : index
    %c0_31 = arith.constant 0 : index
    %c0_32 = arith.constant 0 : index
    %104 = vector.load %arg3[%c0_30, %c0_31, %c0_32] : memref<3x128x128xf32, #tpu.memory_space<vmem>>, vector<1x128x128xf32>
    %105 = vector.shape_cast %104 : vector<1x128x128xf32> to vector<128x128xf32>
    %cst_33 = arith.constant dense<0.000000e+00> : vector<32x128xf32>
    %106 = tpu.matmul %101, %105, %cst_33 {dimension_numbers = #tpu.dot_dimension_numbers<[1], [0], [0], [1], [0, 0, 1, 1], [], []>} : vector<32x128xf32>, vector<128x128xf32>, vector<32x128xf32> -> vector<32x128xf32>
    %c1_34 = arith.constant 1 : index
    %c0_35 = arith.constant 0 : index
    %c0_36 = arith.constant 0 : index
    %107 = vector.load %arg3[%c1_34, %c0_35, %c0_36] : memref<3x128x128xf32, #tpu.memory_space<vmem>>, vector<1x128x128xf32>
    %108 = vector.shape_cast %107 : vector<1x128x128xf32> to vector<128x128xf32>
    %cst_37 = arith.constant dense<0.000000e+00> : vector<32x128xf32>
    %109 = tpu.matmul %99, %108, %cst_37 {dimension_numbers = #tpu.dot_dimension_numbers<[1], [0], [0], [1], [0, 0, 1, 1], [], []>} : vector<32x128xf32>, vector<128x128xf32>, vector<32x128xf32> -> vector<32x128xf32>
    %110 = arith.addf %106, %109 : vector<32x128xf32>
    %c2_38 = arith.constant 2 : index
    %c0_39 = arith.constant 0 : index
    %c0_40 = arith.constant 0 : index
    %111 = vector.load %arg3[%c2_38, %c0_39, %c0_40] : memref<3x128x128xf32, #tpu.memory_space<vmem>>, vector<1x128x128xf32>
    %112 = vector.shape_cast %111 : vector<1x128x128xf32> to vector<128x128xf32>
    %cst_41 = arith.constant dense<0.000000e+00> : vector<32x128xf32>
    %113 = tpu.matmul %103, %112, %cst_41 {dimension_numbers = #tpu.dot_dimension_numbers<[1], [0], [0], [1], [0, 0, 1, 1], [], []>} : vector<32x128xf32>, vector<128x128xf32>, vector<32x128xf32> -> vector<32x128xf32>
    %114 = arith.addf %110, %113 : vector<32x128xf32>
    %115 = vector.broadcast %6 : vector<1x128xf32> to vector<32x128xf32>
    %116 = arith.addf %114, %115 : vector<32x128xf32>
    %117 = vector.extract_strided_slice %116 {offsets = [0, 0], sizes = [16, 128], strides = [1, 1]} : vector<32x128xf32> to vector<16x128xf32>
    %cst_42 = arith.constant dense<0.000000e+00> : vector<128xf32>
    %118 = vector.multi_reduction <add>, %117, %cst_42 [0] : vector<16x128xf32> to vector<128xf32>
    %119 = vector.shape_cast %118 : vector<128xf32> to vector<1x128xf32>
    %120 = arith.mulf %117, %117 : vector<16x128xf32>
    %cst_43 = arith.constant dense<0.000000e+00> : vector<128xf32>
    %121 = vector.multi_reduction <add>, %120, %cst_43 [0] : vector<16x128xf32> to vector<128xf32>
    %122 = vector.shape_cast %121 : vector<128xf32> to vector<1x128xf32>
    %123 = vector.extract_strided_slice %116 {offsets = [16, 0], sizes = [16, 128], strides = [1, 1]} : vector<32x128xf32> to vector<16x128xf32>
    %cst_44 = arith.constant dense<0.000000e+00> : vector<128xf32>
    %124 = vector.multi_reduction <add>, %123, %cst_44 [0] : vector<16x128xf32> to vector<128xf32>
    %125 = vector.shape_cast %124 : vector<128xf32> to vector<1x128xf32>
    %126 = arith.mulf %123, %123 : vector<16x128xf32>
    %cst_45 = arith.constant dense<0.000000e+00> : vector<128xf32>
    %127 = vector.multi_reduction <add>, %126, %cst_45 [0] : vector<16x128xf32> to vector<128xf32>
    %128 = vector.shape_cast %127 : vector<128xf32> to vector<1x128xf32>
    %129 = tpu.concatenate %119, %122, %125, %128 in 0 : vector<1x128xf32>, vector<1x128xf32>, vector<1x128xf32>, vector<1x128xf32> -> vector<4x128xf32>
    %cst_46 = arith.constant dense<0.000000e+00> : vector<4x128xf32>
    %130 = tpu.matmul %129, %2, %cst_46 {dimension_numbers = #tpu.dot_dimension_numbers<[1], [0], [0], [1], [0, 0, 1, 1], [], []>} : vector<4x128xf32>, vector<128x128xf32>, vector<4x128xf32> -> vector<4x128xf32>
    %cst_47 = arith.constant 0.001953125 : f32
    %131 = vector.broadcast %cst_47 : f32 to vector<4x128xf32>
    %132 = arith.mulf %130, %131 : vector<4x128xf32>
    %133 = vector.extract_strided_slice %132 {offsets = [0, 0], sizes = [1, 128], strides = [1, 1]} : vector<4x128xf32> to vector<1x128xf32>
    %134 = vector.extract_strided_slice %132 {offsets = [1, 0], sizes = [1, 128], strides = [1, 1]} : vector<4x128xf32> to vector<1x128xf32>
    %135 = arith.mulf %133, %133 : vector<1x128xf32>
    %136 = arith.subf %134, %135 : vector<1x128xf32>
    %cst_48 = arith.constant 9.99999974E-6 : f32
    %137 = vector.broadcast %cst_48 : f32 to vector<1x128xf32>
    %138 = arith.addf %136, %137 : vector<1x128xf32>
    %139 = math.rsqrt %138 : vector<1x128xf32>
    %140 = arith.mulf %7, %139 : vector<1x128xf32>
    %141 = arith.mulf %133, %140 : vector<1x128xf32>
    %142 = arith.subf %8, %141 : vector<1x128xf32>
    %143 = vector.extract_strided_slice %116 {offsets = [0, 0], sizes = [16, 128], strides = [1, 1]} : vector<32x128xf32> to vector<16x128xf32>
    %144 = vector.broadcast %140 : vector<1x128xf32> to vector<16x128xf32>
    %145 = arith.mulf %143, %144 : vector<16x128xf32>
    %146 = vector.broadcast %142 : vector<1x128xf32> to vector<16x128xf32>
    %147 = arith.addf %145, %146 : vector<16x128xf32>
    %148 = vector.extract_strided_slice %132 {offsets = [2, 0], sizes = [1, 128], strides = [1, 1]} : vector<4x128xf32> to vector<1x128xf32>
    %149 = vector.extract_strided_slice %132 {offsets = [3, 0], sizes = [1, 128], strides = [1, 1]} : vector<4x128xf32> to vector<1x128xf32>
    %150 = arith.mulf %148, %148 : vector<1x128xf32>
    %151 = arith.subf %149, %150 : vector<1x128xf32>
    %cst_49 = arith.constant 9.99999974E-6 : f32
    %152 = vector.broadcast %cst_49 : f32 to vector<1x128xf32>
    %153 = arith.addf %151, %152 : vector<1x128xf32>
    %154 = math.rsqrt %153 : vector<1x128xf32>
    %155 = arith.mulf %7, %154 : vector<1x128xf32>
    %156 = arith.mulf %148, %155 : vector<1x128xf32>
    %157 = arith.subf %8, %156 : vector<1x128xf32>
    %158 = vector.extract_strided_slice %116 {offsets = [16, 0], sizes = [16, 128], strides = [1, 1]} : vector<32x128xf32> to vector<16x128xf32>
    %159 = vector.broadcast %155 : vector<1x128xf32> to vector<16x128xf32>
    %160 = arith.mulf %158, %159 : vector<16x128xf32>
    %161 = vector.broadcast %157 : vector<1x128xf32> to vector<16x128xf32>
    %162 = arith.addf %160, %161 : vector<16x128xf32>
    %163 = tpu.concatenate %147, %162 in 0 : vector<16x128xf32>, vector<16x128xf32> -> vector<32x128xf32>
    %164 = arith.addf %0, %163 : vector<32x128xf32>
    %cst_50 = arith.constant 0.000000e+00 : f32
    %165 = vector.broadcast %cst_50 : f32 to vector<32x128xf32>
    %166 = arith.maximumf %164, %165 : vector<32x128xf32>
    %c0_51 = arith.constant 0 : index
    %c0_52 = arith.constant 0 : index
    %167 = vector.load %arg6[%c0_51, %c0_52] : memref<32x128xf32, #tpu.memory_space<vmem>>, vector<32x128xf32>
    tpu.vector_store %arg6[%c0_51, %c0_52], %166 {strides = array<i32>} : memref<32x128xf32, #tpu.memory_space<vmem>>, vector<32x128xf32>,
    return
  }
  func.func @transform_0(%arg0: i32) -> (i32, i32) {
    %c0_i32 = arith.constant 0 : i32
    %c0_i32_0 = arith.constant 0 : i32
    %c0_i32_1 = arith.constant 0 : i32
    return %c0_i32, %c0_i32_0 : i32, i32
  }
  func.func @transform_1(%arg0: i32) -> (i32, i32, i32) {
    %c0_i32 = arith.constant 0 : i32
    %c0_i32_0 = arith.constant 0 : i32
    %c0_i32_1 = arith.constant 0 : i32
    %c0_i32_2 = arith.constant 0 : i32
    return %c0_i32, %c0_i32_0, %c0_i32_1 : i32, i32, i32
  }
  func.func @transform_2(%arg0: i32) -> (i32, i32, i32) {
    %c0_i32 = arith.constant 0 : i32
    %c0_i32_0 = arith.constant 0 : i32
    %c0_i32_1 = arith.constant 0 : i32
    %c0_i32_2 = arith.constant 0 : i32
    return %c0_i32, %c0_i32_0, %c0_i32_1 : i32, i32, i32
  }
  func.func @transform_3(%arg0: i32) -> (i32, i32) {
    %c0_i32 = arith.constant 0 : i32
    %c0_i32_0 = arith.constant 0 : i32
    %c0_i32_1 = arith.constant 0 : i32
    return %c0_i32, %c0_i32_0 : i32, i32
  }
  func.func @transform_4(%arg0: i32) -> (i32, i32) {
    %c0_i32 = arith.constant 0 : i32
    %c0_i32_0 = arith.constant 0 : i32
    %c0_i32_1 = arith.constant 0 : i32
    return %c0_i32, %c0_i32_0 : i32, i32
  }
  func.func @transform_5(%arg0: i32) -> (i32, i32) {
    %c0_i32 = arith.constant 0 : i32
    %c0_i32_0 = arith.constant 0 : i32
    %c0_i32_1 = arith.constant 0 : i32
    return %c0_i32, %c0_i32_0 : i32, i32
  }
}

</mosaic_0001>

<bundles_post_ra>
// kernel: tpu_custom_call.1
= control target key start
LH: loop header
LB: loop body
LE: loop exit
PB: predicated region body
PF: predicated region fallthrough
CT: control target
= control target key end

     0   :  { %10 = vsyncpa [#allocation3], 0  ;;  %s2391_s0 = inlined_call_operand.hbm [shape: f32[32,128], index: 0, kind: input, shape index: {}]   ;;  %s2392_s1 = inlined_call_operand.hbm [shape: f32[3,128,128], index: 1, kind: input, shape index: {}]   ;;  %s2393_s2 = inlined_call_operand.hbm [shape: f32[3,128,128], index: 2, kind: input, shape index: {}]   ;;  %s2394_s3 = inlined_call_operand.vmem [shape: f32[8,128], index: 3, kind: input, shape index: {}]   ;;  %s2395_s4 = inlined_call_operand.hbm [shape: f32[128,128], index: 4, kind: input, shape index: {}]   ;;  %s2396_s5 = inlined_call_operand.hbm [shape: f32[32,128], index: 5, kind: output, shape index: {}]  }
   0x1   :  { %11 = vsyncpa [#allocation6], 0 }
   0x2   :  { %12 = vsyncpa [#allocation9], 0 }
   0x3   :  { %13 = vsyncpa [#allocation4], 0  ;;  %s2056_s18 = smov [#allocation5]   ;;  %s2057_s20 = smov [#allocation2]  }
   0x4   :  { %s31_s19 = sshll.u32 %s2056_s18, 4  ;;  %s19_s21 = sshll.u32 %s2057_s20, 4  ;;  %s32_s19 = int_to_ptr.vmem [resolvable:$true] %s31_s19  ;;  %s2096_s21 = int_to_ptr.vmem [resolvable:$true] %s19_s21 }
   0x5   :  { %s1938_s24 = scalar_lea.hbm %s2392_s1, 6144 }
   0x6   :  { %p1939_p0 = scmp.ne.s32.totalorder %s2392_s1, %s1938_s24  ;;  %p1942_p1 = scmp.lt.u32.totalorder %s1938_s24, %s2392_s1 }
   0x8   :  { %p1944_p2 = pnand %p1942_p1, %p1939_p0 }
   0xa   :  { %1947 = shalt.err (!%p1944_p2)
}
   0xb   :  { %s1948_s29 = scalar_lea.vmem %s32_s19, 6144  ;;  %p1953_p4 = scmp.lt.s32.totalorder %s32_s19, %s32_s19 }
   0xc   :  { %p1949_p3 = scmp.ne.s32.totalorder %s32_s19, %s1948_s29  ;;  %p1954_p5 = scmp.lt.s32.totalorder %s1948_s29, %s1948_s29 }
   0xe   :  { %p1955_p6 = por %p1954_p5, %p1953_p4 }
  0x10   :  { %p1956_p7 = pnand %p1955_p6, %p1949_p3 }
  0x12   :  { %1959 = shalt.err (!%p1956_p7)
}
  0x13   :  { %s2058_s30 = smov 128   ;;  %s2059_s6 = smov 8  }
  0x14   :  { %37 = dma.hbm_to_vmem [thread:$0]  %s2392_s1, 6144, %s32_s19, [#allocation6], %s2058_s30, %s2058_s30, %s2059_s6  }
  0x15   :  { %s1960_s11 = scalar_lea.hbm %s2391_s0, 512 }
  0x16   :  { %p1961_p8 = scmp.ne.s32.totalorder %s2391_s0, %s1960_s11  ;;  %p1964_p9 = scmp.lt.u32.totalorder %s1960_s11, %s2391_s0 }
  0x18   :  { %p1966_p10 = pnand %p1964_p9, %p1961_p8 }
  0x1a   :  { %1969 = shalt.err (!%p1966_p10)
}
  0x1b   :  { %s1970_s16 = scalar_lea.vmem %s2096_s21, 512  ;;  %p1975_p12 = scmp.lt.s32.totalorder %s2096_s21, %s2096_s21 }
  0x1c   :  { %p1971_p11 = scmp.ne.s32.totalorder %s2096_s21, %s1970_s16  ;;  %p1976_p13 = scmp.lt.s32.totalorder %s1970_s16, %s1970_s16 }
  0x1e   :  { %p1977_p0 = por %p1976_p13, %p1975_p12 }
  0x20   :  { %p1978_p1 = pnand %p1977_p0, %p1971_p11 }
  0x22   :  { %1981 = shalt.err (!%p1978_p1)
}
  0x23   :  { %25 = dma.hbm_to_vmem [thread:$0]  %s2391_s0, 512, %s2096_s21, [#allocation3], %s2058_s30, %s2058_s30, %s2059_s6  }
  0x24   :  { %s2060_s18 = smov [#allocation7]   ;;  %s2061_s20 = smov [#allocation8]  }
  0x25   :  { %s43_s19 = sshll.u32 %s2060_s18, 4  ;;  %s57_s22 = sshll.u32 %s2061_s20, 4  ;;  %s44_s19 = int_to_ptr.vmem [resolvable:$true] %s43_s19  ;;  %s2133_s22 = int_to_ptr.vmem [resolvable:$true] %s57_s22 }
  0x26   :  { %s1982_s25 = scalar_lea.hbm %s2393_s2, 6144 }
  0x27   :  { %p1983_p2 = scmp.ne.s32.totalorder %s2393_s2, %s1982_s25  ;;  %p1986_p3 = scmp.lt.u32.totalorder %s1982_s25, %s2393_s2 }
  0x29   :  { %p1988_p4 = pnand %p1986_p3, %p1983_p2 }
  0x2b   :  { %1991 = shalt.err (!%p1988_p4)
}
  0x2c   :  { %s1992_s0 = scalar_lea.vmem %s44_s19, 6144  ;;  %p1997_p6 = scmp.lt.s32.totalorder %s44_s19, %s44_s19 }
  0x2d   :  { %p1993_p5 = scmp.ne.s32.totalorder %s44_s19, %s1992_s0  ;;  %p1998_p7 = scmp.lt.s32.totalorder %s1992_s0, %s1992_s0 }
  0x2f   :  { %p1999_p8 = por %p1998_p7, %p1997_p6 }
  0x31   :  { %p2000_p9 = pnand %p1999_p8, %p1993_p5 }
  0x33   :  { %2003 = shalt.err (!%p2000_p9)
}
  0x34   :  { %49 = dma.hbm_to_vmem [thread:$0]  %s2393_s2, 6144, %s44_s19, [#allocation6], %s2058_s30, %s2058_s30, %s2059_s6  }
  0x35   :  { %s2004_s10 = scalar_lea.hbm %s2395_s4, 2048 }
  0x36   :  { %p2005_p10 = scmp.ne.s32.totalorder %s2395_s4, %s2004_s10  ;;  %p2008_p11 = scmp.lt.u32.totalorder %s2004_s10, %s2395_s4 }
  0x38   :  { %p2010_p12 = pnand %p2008_p11, %p2005_p10 }
  0x3a   :  { %2013 = shalt.err (!%p2010_p12)
}
  0x3b   :  { %s2014_s15 = scalar_lea.vmem %s2133_s22, 2048  ;;  %p2019_p0 = scmp.lt.s32.totalorder %s2133_s22, %s2133_s22 }
  0x3c   :  { %p2015_p13 = scmp.ne.s32.totalorder %s2133_s22, %s2014_s15  ;;  %p2020_p1 = scmp.lt.s32.totalorder %s2014_s15, %s2014_s15 }
  0x3e   :  { %p2021_p2 = por %p2020_p1, %p2019_p0 }
  0x40   :  { %p2022_p3 = pnand %p2021_p2, %p2015_p13 }
  0x42   :  { %2025 = shalt.err (!%p2022_p3)
}
  0x43   :  { %63 = dma.hbm_to_vmem [thread:$0]  %s2395_s4, 2048, %s2133_s22, [#allocation9], %s2058_s30, %s2058_s30, %s2059_s6  }
  0x44   :  { %2048 = dma.done.wait [#allocation3], 512  }
  0x45   :  { %2049 = vsyncadd [#allocation3], 4294966784 }
  0x46   :  { %2050 = dma.done.wait [#allocation6], 12288  }
  0x47   :  { %2051 = vsyncadd [#allocation6], 4294955008 }
  0x48   :  { %2052 = dma.done.wait [#allocation9], 2048  }
  0x49   :  { %2053 = vsyncadd [#allocation9], 4294965248  ;;  %v2062_v0 = vmov 0.0|0.0   ;;  %v217_v1 = vld [vmem:[#allocation5 + $0x80] sm:$0xff]  ;;  %v218_v2 = vld [vmem:[#allocation5 + $0x88] sm:$0xff]  ;;  %v97_v24 = vlaneseq  ;;  %v2063_v46 = vmov 0.0  }
  0x4a   :  { %1763 = vmatprep.subr.bf16.mxu1 %v2062_v0  ;;  %v219_v3 = vld [vmem:[#allocation5 + $0x90] sm:$0xff]  ;;  %v1667_v4 = vpack.c.bf16 %v218_v2, %v217_v1  ;;  %v220_v5 = vld [vmem:[#allocation5 + $0x98] sm:$0xff]  ;;  %v221_v7 = vld [vmem:[#allocation5 + $0xa0] sm:$0xff]  ;;  %vm2064_vm6 = vmmov 0   ;;  %vm549_vm7 = vcmask 1040384   ;;  %vm551_vm8 = vcmask 1041408  }
  0x4b   :  { %v1671_v6 = vpack.c.bf16 %v220_v5, %v219_v3  ;;  %v222_v8 = vld [vmem:[#allocation5 + $0xa8] sm:$0xff]  ;;  %v2171_v10 = vld [vmem:[#allocation2] sm:$0xff]  ;;  %v223_v11 = vld [vmem:[#allocation5 + $0xb0] sm:$0xff]  ;;  %v2180_v32 = vshrl.u32 %v97_v24, 7  ;;  %1515 = vmatprep.mubr.msk.f32.mxu1 %vm2064_vm6, %v2063_v46  ;;  %vm553_vm9 = vcmask 1042432  }
  0x4c   :  { %1668 = vmatprep.subr.bf16.mxu0 %v1667_v4  ;;  %v1675_v9 = vpack.c.bf16 %v222_v8, %v221_v7  ;;  %v224_v12 = vld [vmem:[#allocation5 + $0xb8] sm:$0xff]  ;;  %1401 = vmatprep.mubr.f32.mxu0 %v2171_v10  ;;  %v225_v14 = vld [vmem:[#allocation5 + $0xc0] sm:$0xff]  ;;  %v226_v15 = vld [vmem:[#allocation5 + $0xc8] sm:$0xff]  ;;  %v174_v38 = vrot.slane %v2171_v10, 7 }
  0x4d   :  { %1670 = vmatpush3.bf16.msra.mxu0 %v1667_v4  ;;  %v1679_v13 = vpack.c.bf16 %v224_v12, %v223_v11  ;;  %v1683_v16 = vpack.c.bf16 %v226_v15, %v225_v14  ;;  %v227_v17 = vld [vmem:[#allocation5 + $0xd0] sm:$0xff]  ;;  %v228_v18 = vld [vmem:[#allocation5 + $0xd8] sm:$0xff]  ;;  %v229_v20 = vld [vmem:[#allocation5 + $0xe0] sm:$0xff]  ;;  %v106_v37 = vand.u32 15, %v2180_v32  ;;  %vm178_vm1 = vcmp.lt.s32.totalorder %v2180_v32, 1 }
  0x4e   :  { %1672 = vmatprep.subr.bf16.mxu0 %v1671_v6  ;;  %v1687_v19 = vpack.c.bf16 %v228_v18, %v227_v17  ;;  %v81_v21 = vld [vmem:[#allocation8] sm:$0xff]  ;;  %v82_v22 = vld [vmem:[#allocation8 + $0x8] sm:$0xff]  ;;  %v83_v26 = vld [vmem:[#allocation8 + $0x10] sm:$0xff]  ;;  %v100_v1 = vadd.s32 16, %v2180_v32  ;;  %vm191_vm3 = vcmp.lt.s32.totalorder %v2180_v32, 7 }
  0x4f   :  { %v230_v23 = vld [vmem:[#allocation5 + $0xe8] sm:$0xff]  ;;  %v2174_v25 = vpack.c.bf16 %v82_v22, %v81_v21  ;;  %v84_v27 = vld [vmem:[#allocation8 + $0x18] sm:$0xff]  ;;  %v231_v30 = vld [vmem:[#allocation5 + $0xf0] sm:$0xff]  ;;  %vm150_vm0 = vcmp.ne.s32.totalorder %v106_v37, 0 }
  0x50   :  { %v2177_v28 = vpack.c.bf16 %v84_v27, %v83_v26  ;;  %v1691_v29 = vpack.c.bf16 %v230_v23, %v229_v20  ;;  %v232_v31 = vld [vmem:[#allocation5 + $0xf8] sm:$0xff]  ;;  %v200_v34 = vld [vmem:[#allocation5] sm:$0xff]  ;;  %v201_v35 = vld [vmem:[#allocation5 + $0x8] sm:$0xff]  ;;  %v2195_v47 = vsel %vm150_vm0, 1.0, %v2063_v46  ;;  %v120_v5 = vand.u32 15, %v100_v1 }
  0x51   :  { %1674 = vmatpush3.bf16.msra.mxu0 %v1671_v6  ;;  %1765 = vmatpush3.bf16.msra.mxu1 %v2174_v25  ;;  %v1695_v33 = vpack.c.bf16 %v232_v31, %v231_v30  ;;  %v2184_v36 = vld [vmem:[#allocation2 + $0x18] sm:$0xff]  ;;  %v1699_v39 = vpack.c.bf16 %v201_v35, %v200_v34  ;;  %v202_v41 = vld [vmem:[#allocation5 + $0x10] sm:$0xff]  ;;  %v2190_v43 = vld [vmem:[#allocation2 + $0x8] sm:$0xff]  ;;  %v187_v20 = vrot.slane %v2171_v10, 1 }
  0x52   :  { %1676 = vmatprep.subr.bf16.mxu0 %v1675_v9  ;;  %1766 = vmatprep.subr.bf16.mxu1 %v2062_v0  ;;  %v177_v40 = vrot.slane %v2184_v36, 7  ;;  %v203_v42 = vld [vmem:[#allocation5 + $0x18] sm:$0xff]  ;;  %v2192_v45 = vld [vmem:[#allocation2 + $0x10] sm:$0xff]  ;;  %v204_v49 = vld [vmem:[#allocation5 + $0x20] sm:$0xff]  ;;  %vm152_vm2 = vcmp.ne.s32.totalorder %v120_v5, 0  ;;  %v175_v11 = vrot.slane %v2190_v43, 7 }
  0x53   :  { %v1703_v44 = vpack.c.bf16 %v203_v42, %v202_v41  ;;  %v205_v50 = vld [vmem:[#allocation5 + $0x28] sm:$0xff]  ;;  %v206_v53 = vld [vmem:[#allocation5 + $0x30] sm:$0xff]  ;;  %v207_v54 = vld [vmem:[#allocation5 + $0x38] sm:$0xff]  ;;  %v176_v6 = vrot.slane %v2192_v45, 7  ;;  %v188_v21 = vrot.slane %v2190_v43, 1 }
  0x54   :  { %v182_v48 = vsel %vm178_vm1, %v177_v40, %v174_v38  ;;  %v1707_v52 = vpack.c.bf16 %v205_v50, %v204_v49  ;;  %v1711_v55 = vpack.c.bf16 %v207_v54, %v206_v53  ;;  %v208_v56 = vld [vmem:[#allocation5 + $0x40] sm:$0xff]  ;;  %v209_v57 = vld [vmem:[#allocation5 + $0x48] sm:$0xff]  ;;  %v210_v59 = vld [vmem:[#allocation5 + $0x50] sm:$0xff]  ;;  %v181_v17 = vsel %vm178_vm1, %v174_v38, %v175_v11 }
  0x55   :  { %1678 = vmatpush3.bf16.msra.mxu0 %v1675_v9  ;;  %1768 = vmatpush3.bf16.msra.mxu1 %v2177_v28  ;;  %v183_v51 = vmul.f32 %v2195_v47, %v182_v48  ;;  %v1715_v58 = vpack.c.bf16 %v209_v57, %v208_v56  ;;  %v211_v60 = vld [vmem:[#allocation5 + $0x58] sm:$0xff]  ;;  %v212_v62 = vld [vmem:[#allocation5 + $0x60] sm:$0xff]  ;;  %v213_v63 = vld [vmem:[#allocation5 + $0x68] sm:$0xff]  ;;  %v180_v14 = vsel %vm178_vm1, %v175_v11, %v176_v6  ;;  %v101_v48 = vadd.s32 24, %v2180_v32 }
  0x56   :  { %1680 = vmatprep.subr.bf16.mxu0 %v1679_v13  ;;  %1769 = vmatprep.subr.bf16.mxu1 %v2062_v0  ;;  %v1719_v61 = vpack.c.bf16 %v211_v60, %v210_v59  ;;  %v1723_v2 = vpack.c.bf16 %v213_v63, %v212_v62  ;;  %v214_v3 = vld [vmem:[#allocation5 + $0x70] sm:$0xff]  ;;  %v215_v4 = vld [vmem:[#allocation5 + $0x78] sm:$0xff]  ;;  %v404_v8 = vld [vmem:[#allocation5 + $0x100] sm:$0xff]  ;;  %v179_v24 = vsel %vm178_vm1, %v176_v6, %v177_v40  ;;  %v190_v56 = vrot.slane %v2184_v36, 1 }
  0x57   :  { %v1727_v7 = vpack.c.bf16 %v215_v4, %v214_v3  ;;  %v405_v9 = vld [vmem:[#allocation5 + $0x108] sm:$0xff]  ;;  %v406_v15 = vld [vmem:[#allocation5 + $0x110] sm:$0xff]  ;;  %v408_v22 = vld [vmem:[#allocation5 + $0x120] sm:$0xff]  ;;  %v194_v27 = vsel %vm191_vm3, %v187_v20, %v188_v21  ;;  %v127_v53 = vand.u32 15, %v101_v48 }
  0x58   :  { %v1731_v12 = vpack.c.bf16 %v405_v9, %v404_v8  ;;  %v409_v23 = vld [vmem:[#allocation5 + $0x128] sm:$0xff]  ;;  %v410_v10 = vld [vmem:[#allocation5 + $0x130] sm:$0xff]  ;;  %v412_v31 = vld [vmem:[#allocation5 + $0x140] sm:$0xff]  ;;  %v195_v59 = vsel %vm191_vm3, %v190_v56, %v187_v20 }
  0x59   :  { %1682 = vmatpush3.bf16.msra.mxu0 %v1679_v13  ;;  %v2211_v13 = vsel %vm152_vm2, 1.0, %v2063_v46  ;;  %v1739_v26 = vpack.c.bf16 %v409_v23, %v408_v22  ;;  %v414_v35 = vld [vmem:[#allocation5 + $0x150] sm:$0xff]  ;;  %v415_v37 = vld [vmem:[#allocation5 + $0x158] sm:$0xff]  ;;  %v416_v40 = vld [vmem:[#allocation5 + $0x160] sm:$0xff]  ;;  %vm165_vm5 = vcmp.ne.s32.totalorder %v127_v53, 15 }
  0x5a   :  { %1684 = vmatprep.subr.bf16.mxu0 %v1683_v16  ;;  %v185_v18 = vmul.f32 %v2211_v13, %v180_v14  ;;  %v1751_v38 = vpack.c.bf16 %v415_v37, %v414_v35  ;;  %v417_v41 = vld [vmem:[#allocation5 + $0x168] sm:$0xff]  ;;  %v418_v49 = vld [vmem:[#allocation5 + $0x170] sm:$0xff]  ;;  %v419_v50 = vld [vmem:[#allocation5 + $0x178] sm:$0xff] }
  0x5b   :  { %v1755_v42 = vpack.c.bf16 %v417_v41, %v416_v40  ;;  %v85_v62 = vld [vmem:[#allocation8 + $0x20] sm:$0xff]  ;;  %v86_v63 = vld [vmem:[#allocation8 + $0x28] sm:$0xff]  ;;  %v88_v3 = vld [vmem:[#allocation8 + $0x38] sm:$0xff] }
  0x5c   :  { %v1770_v1 = vpack.c.bf16 %v86_v63, %v85_v62  ;;  %v91_v6 = vld [vmem:[#allocation8 + $0x50] sm:$0xff]  ;;  %v93_v9 = vld [vmem:[#allocation8 + $0x60] sm:$0xff]  ;;  %v94_v11 = vld [vmem:[#allocation8 + $0x68] sm:$0xff] }
  0x5d   :  { %1686 = vmatpush3.bf16.msra.mxu0 %v1683_v16  ;;  %v407_v16 = vld [vmem:[#allocation5 + $0x118] sm:$0xff]  ;;  %v95_v14 = vld [vmem:[#allocation8 + $0x70] sm:$0xff] }
  0x5e   :  { %1688 = vmatprep.subr.bf16.mxu0 %v1687_v19  ;;  %1771 = vmatpush3.bf16.msra.mxu1 %v1770_v1 }
  0x5f   :  { %1772 = vmatprep.subr.bf16.mxu1 %v2062_v0 }
  0x61   :  { %1690 = vmatpush3.bf16.msra.mxu0 %v1687_v19  ;;  %v1735_v19 = vpack.c.bf16 %v407_v16, %v406_v15  ;;  %v96_v15 = vld [vmem:[#allocation8 + $0x78] sm:$0xff] }
  0x62   :  { %1692 = vmatprep.subr.bf16.mxu0 %v1691_v29  ;;  %v1785_v16 = vpack.c.bf16 %v96_v15, %v95_v14  ;;  %v725_v14 = vld [vmem:[#allocation7 + $0xa8] sm:$0xff] }
  0x65   :  { %1694 = vmatpush3.bf16.msra.mxu0 %v1691_v29  ;;  %v411_v29 = vld [vmem:[#allocation5 + $0x138] sm:$0xff] }
  0x66   :  { %1696 = vmatprep.subr.bf16.mxu0 %v1695_v33  ;;  %v1743_v30 = vpack.c.bf16 %v411_v29, %v410_v10 }
  0x69   :  { %1698 = vmatpush3.bf16.msra.mxu0 %v1695_v33  ;;  %v413_v33 = vld [vmem:[#allocation5 + $0x148] sm:$0xff] }
  0x6a   :  { %1700 = vmatprep.subr.bf16.mxu0 %v1699_v39  ;;  %v1747_v34 = vpack.c.bf16 %v413_v33, %v412_v31 }
  0x6c   :  { %1402 = vmatmul.mubr.f32.vlgmr.msra.gmra.mrb[0].mxu0 %v2190_v43 }
  0x6d   :  { %1702 = vmatpush3.bf16.msra.mxu0 %v1699_v39  ;;  %1404 = vmatprep.mubr.f32.mxu0 %v2192_v45  ;;  %v99_v39 = vadd.s32 8, %v2180_v32 }
  0x6e   :  { %1704 = vmatprep.subr.bf16.mxu0 %v1703_v44 }
  0x70   :  { %1405 = vmatmul.mubr.f32.gmra.mrb[2].mxu0 %v2184_v36 }
  0x71   :  { %1706 = vmatpush3.bf16.msra.mxu0 %v1703_v44  ;;  %1439 = vmatprep.mubr.f32.mxu0 %v183_v51  ;;  %v113_v44 = vand.u32 15, %v99_v39  ;;  %v189_v51 = vrot.slane %v2192_v45, 1 }
  0x72   :  { %1708 = vmatprep.subr.bf16.mxu0 %v1707_v52 }
  0x73   :  { %vm163_vm4 = vcmp.ne.s32.totalorder %v113_v44, 15  ;;  %v192_v60 = vsel %vm191_vm3, %v189_v51, %v190_v56 }
  0x74   :  { %v2233_v54 = vsel %vm163_vm4, 1.0, %v2063_v46 }
  0x75   :  { %1710 = vmatpush3.bf16.msra.mxu0 %v1707_v52  ;;  %v1759_v52 = vpack.c.bf16 %v419_v50, %v418_v49 }
  0x76   :  { %1712 = vmatprep.subr.bf16.mxu0 %v1711_v55 }
  0x79   :  { %1714 = vmatpush3.bf16.msra.mxu0 %v1711_v55  ;;  %v193_v55 = vsel %vm191_vm3, %v188_v21, %v189_v51 }
  0x7a   :  { %1716 = vmatprep.subr.bf16.mxu0 %v1715_v58  ;;  %v197_v57 = vmul.f32 %v2233_v54, %v193_v55 }
  0x7d   :  { %1718 = vmatpush3.bf16.msra.mxu0 %v1715_v58  ;;  %v2240_v58 = vsel %vm165_vm5, 1.0, %v2063_v46 }
  0x7e   :  { %1720 = vmatprep.subr.bf16.mxu0 %v1719_v61 }
  0x81   :  { %1722 = vmatpush3.bf16.msra.mxu0 %v1719_v61  ;;  %v199_v61 = vmul.f32 %v2240_v58, %v195_v59 }
  0x82   :  { %1724 = vmatprep.subr.bf16.mxu0 %v1723_v2 }
  0x85   :  { %1726 = vmatpush3.bf16.msra.mxu0 %v1723_v2  ;;  %v87_v2 = vld [vmem:[#allocation8 + $0x30] sm:$0xff] }
  0x86   :  { %1728 = vmatprep.subr.bf16.mxu0 %v1727_v7  ;;  %v1773_v4 = vpack.c.bf16 %v88_v3, %v87_v2 }
  0x88   :  { %1774 = vmatpush3.bf16.msra.mxu1 %v1773_v4 }
  0x89   :  { %1730 = vmatpush3.bf16.msra.mxu0 %v1727_v7  ;;  %1775 = vmatprep.subr.bf16.mxu1 %v2062_v0  ;;  %v92_v7 = vld [vmem:[#allocation8 + $0x58] sm:$0xff] }
  0x8a   :  { %1732 = vmatprep.subr.bf16.mxu0 %v1731_v12  ;;  %v1779_v8 = vpack.c.bf16 %v92_v7, %v91_v6  ;;  %v721_v6 = vld [vmem:[#allocation7 + $0x88] sm:$0xff] }
  0x8c   :  { %1440 = vmatmul.mubr.f32.vlgmr.msra.gmra.mrb[0].mxu0 %v181_v17  ;;  %v511_v17 = vsub.s32 0, %v2180_v32 }
  0x8d   :  { %1734 = vmatpush3.bf16.msra.mxu0 %v1731_v12  ;;  %1442 = vmatprep.mubr.f32.mxu0 %v185_v18  ;;  %v1782_v12 = vpack.c.bf16 %v94_v11, %v93_v9  ;;  %v2268_v18 = vld [vmem:[%s2394_s3] sm:$0xff]  ;;  %v723_v9 = vld [vmem:[#allocation7 + $0x98] sm:$0xff]  ;;  %s2065_s3 = smov [#allocation10]  }
  0x8e   :  { %1736 = vmatprep.subr.bf16.mxu0 %v1735_v19  ;;  %s1197_s17 = sshll.u32 %s2065_s3, 4  ;;  %s1198_s17 = int_to_ptr.vmem [resolvable:$true] %s1197_s17 }
  0x8f   :  { %s2026_s18 = scalar_lea.vmem %s1198_s17, 512  ;;  %p2031_p5 = scmp.lt.s32.totalorder %s1198_s17, %s1198_s17 }
  0x90   :  { %1443 = vmatmul.mubr.f32.gmra.mrb[2].mxu0 %v179_v24  ;;  %p2027_p4 = scmp.ne.s32.totalorder %s1198_s17, %s2026_s18  ;;  %p2032_p6 = scmp.lt.s32.totalorder %s2026_s18, %s2026_s18 }
  0x91   :  { %1738 = vmatpush3.bf16.msra.mxu0 %v1735_v19  ;;  %1477 = vmatprep.mubr.f32.mxu0 %v194_v27  ;;  %v512_v19 = vrot.slane %v2268_v18, %v511_v17  ;;  %v727_v17 = vld [vmem:[#allocation7 + $0xb8] sm:$0xff] }
  0x92   :  { %1740 = vmatprep.subr.bf16.mxu0 %v1739_v26  ;;  %p2033_p7 = por %p2032_p6, %p2031_p5 }
  0x94   :  { %p2034_p8 = pnand %p2033_p7, %p2027_p4 }
  0x95   :  { %1742 = vmatpush3.bf16.msra.mxu0 %v1739_v26 }
  0x96   :  { %1744 = vmatprep.subr.bf16.mxu0 %v1743_v30 }
  0x99   :  { %1746 = vmatpush3.bf16.msra.mxu0 %v1743_v30 }
  0x9a   :  { %1748 = vmatprep.subr.bf16.mxu0 %v1747_v34 }
  0x9d   :  { %1750 = vmatpush3.bf16.msra.mxu0 %v1747_v34 }
  0x9e   :  { %1752 = vmatprep.subr.bf16.mxu0 %v1751_v38 }
  0xa1   :  { %1754 = vmatpush3.bf16.msra.mxu0 %v1751_v38 }
  0xa2   :  { %1756 = vmatprep.subr.bf16.mxu0 %v1755_v42 }
  0xa5   :  { %1758 = vmatpush3.bf16.msra.mxu0 %v1755_v42 }
  0xa6   :  { %1760 = vmatprep.subr.bf16.mxu0 %v1759_v52 }
  0xa9   :  { %1762 = vmatpush3.bf16.msra.mxu0 %v1759_v52 }
  0xaa   :  { %1883 = vmatprep.subr.bf16.mxu0 %v2062_v0 }
  0xac   :  { %1478 = vmatmul.mubr.f32.vlgmr.msra.gmra.mrb[0].mxu0 %v197_v57 }
  0xad   :  { %1480 = vmatprep.mubr.f32.mxu0 %v192_v60  ;;  %1885 = vmatpush3.bf16.msra.mxu0 %v2174_v25  ;;  %v89_v25 = vld [vmem:[#allocation8 + $0x40] sm:$0xff] }
  0xae   :  { %1886 = vmatprep.subr.bf16.mxu0 %v2062_v0 }
  0xb0   :  { %1481 = vmatmul.mubr.f32.gmra.mrb[2].mxu0 %v199_v61 }
  0xb1   :  { %1888 = vmatpush3.bf16.msra.mxu0 %v2177_v28  ;;  %v90_v28 = vld [vmem:[#allocation8 + $0x48] sm:$0xff]  ;;  %1664 = vmatprep.mubr.msk.f32.mxu0 %vm2064_vm6, %v2063_v46 }
  0xb2   :  { %1889 = vmatprep.subr.bf16.mxu0 %v2062_v0  ;;  %v1776_v5 = vpack.c.bf16 %v90_v28, %v89_v25 }
  0xb4   :  { %1777 = vmatpush3.bf16.msra.mxu1 %v1776_v5 }
  0xb5   :  { %1891 = vmatpush3.bf16.msra.mxu0 %v1770_v1  ;;  %1778 = vmatprep.subr.bf16.mxu1 %v2062_v0 }
  0xb6   :  { %1892 = vmatprep.subr.bf16.mxu0 %v2062_v0 }
  0xb8   :  { %1780 = vmatpush3.bf16.msra.mxu1 %v1779_v8 }
  0xb9   :  { %1894 = vmatpush3.bf16.msra.mxu0 %v1773_v4  ;;  %1781 = vmatprep.subr.bf16.mxu1 %v2062_v0 }
  0xba   :  { %1895 = vmatprep.subr.bf16.mxu0 %v2062_v0 }
  0xbc   :  { %1783 = vmatpush3.bf16.msra.mxu1 %v1782_v12 }
  0xbd   :  { %1897 = vmatpush3.bf16.msra.mxu0 %v1776_v5  ;;  %1784 = vmatprep.subr.bf16.mxu1 %v2062_v0  ;;  %v720_v5 = vld [vmem:[#allocation7 + $0x80] sm:$0xff] }
  0xbe   :  { %1898 = vmatprep.subr.bf16.mxu0 %v2062_v0  ;;  %v1787_v7 = vpack.c.bf16 %v721_v6, %v720_v5 }
  0xc0   :  { %1786 = vmatpush3.bf16.msra.mxu1 %v1785_v16 }
  0xc1   :  { %1900 = vmatpush3.bf16.msra.mxu0 %v1779_v8  ;;  %1788 = vmatprep.subr.bf16.mxu1 %v1787_v7  ;;  %v722_v8 = vld [vmem:[#allocation7 + $0x90] sm:$0xff] }
  0xc2   :  { %1901 = vmatprep.subr.bf16.mxu0 %v2062_v0  ;;  %v1791_v11 = vpack.c.bf16 %v723_v9, %v722_v8 }
  0xc5   :  { %1903 = vmatpush3.bf16.msra.mxu0 %v1782_v12  ;;  %v724_v12 = vld [vmem:[#allocation7 + $0xa0] sm:$0xff] }
  0xc6   :  { %1904 = vmatprep.subr.bf16.mxu0 %v2062_v0  ;;  %v1795_v15 = vpack.c.bf16 %v725_v14, %v724_v12  ;;  %v705_v14 = vld [vmem:[#allocation7 + $0x10] sm:$0xff] }
  0xc9   :  { %1906 = vmatpush3.bf16.msra.mxu0 %v1785_v16  ;;  %v726_v16 = vld [vmem:[#allocation7 + $0xb0] sm:$0xff] }
 0x17f   :  { %v1479_v20 = vpop.f32.mrb[0].mxu0 }
 0x180   :  { %v2271_v46 = vadd.f32 %v1479_v20, %v512_v19  ;;  %v486_v21 = vpop.f32.mrb[1].mxu0  ;;  %v728_v20 = vld [vmem:[#allocation7 + $0xc0] sm:$0xff] }
 0x181   :  { %v2273_v22 = vadd.f32 %v512_v19, %v486_v21  ;;  %v729_v21 = vld [vmem:[#allocation7 + $0xc8] sm:$0xff] }
 0x182   :  { %v525_v0 = vmul.f32 %v2271_v46, %v2271_v46 }
 0x183   :  { %v517_v23 = vadd.f32 %v2271_v46, %v2273_v22  ;;  %v524_v24 = vmul.f32 %v2273_v22, %v2273_v22  ;;  %v1482_v26 = vpop.f32.mrb[2].mxu0 }
 0x184   :  { %v2281_v27 = vadd.f32 %v1482_v26, %v512_v19  ;;  %v496_v10 = vpop.f32.mrb[3].mxu0 }
 0x185   :  { %v518_v29 = vrot.slane %v517_v23, 4  ;;  %v526_v30 = vadd.f32 %v525_v0, %v524_v24  ;;  %v2283_v31 = vadd.f32 %v512_v19, %v496_v10  ;;  %v1799_v19 = vpack.c.bf16 %v727_v17, %v726_v16  ;;  %v731_v24 = vld [vmem:[#allocation7 + $0xd8] sm:$0xff]  ;;  %v732_v10 = vld [vmem:[#allocation7 + $0xe0] sm:$0xff] }
 0x186   :  { %v541_v33 = vmul.f32 %v2281_v27, %v2281_v27  ;;  %v1803_v0 = vpack.c.bf16 %v729_v21, %v728_v20  ;;  %v707_v21 = vld [vmem:[#allocation7 + $0x20] sm:$0xff] }
 0x187   :  { %v519_v34 = vadd.f32 %v518_v29, %v517_v23  ;;  %v527_v35 = vrot.slane %v526_v30, 4  ;;  %v533_v37 = vadd.f32 %v2281_v27, %v2283_v31  ;;  %v540_v38 = vmul.f32 %v2283_v31, %v2283_v31  ;;  %v730_v23 = vld [vmem:[#allocation7 + $0xd0] sm:$0xff]  ;;  %v733_v29 = vld [vmem:[#allocation7 + $0xe8] sm:$0xff] }
 0x188   :  { %v1807_v26 = vpack.c.bf16 %v731_v24, %v730_v23 }
 0x189   :  { %v520_v39 = vrot.slane %v519_v34, 2  ;;  %v528_v40 = vadd.f32 %v527_v35, %v526_v30  ;;  %v534_v41 = vrot.slane %v533_v37, 4  ;;  %v542_v42 = vadd.f32 %v541_v33, %v540_v38  ;;  %v734_v33 = vld [vmem:[#allocation7 + $0xf0] sm:$0xff]  ;;  %v704_v38 = vld [vmem:[#allocation7 + $0x8] sm:$0xff] }
 0x18a   :  { %v1811_v30 = vpack.c.bf16 %v733_v29, %v732_v10  ;;  %v709_v10 = vld [vmem:[#allocation7 + $0x30] sm:$0xff]  ;;  %v710_v29 = vld [vmem:[#allocation7 + $0x38] sm:$0xff] }
 0x18b   :  { %v521_v44 = vadd.f32 %v520_v39, %v519_v34  ;;  %v529_v48 = vrot.slane %v528_v40, 2  ;;  %v535_v49 = vadd.f32 %v534_v41, %v533_v37  ;;  %v543_v50 = vrot.slane %v542_v42, 4  ;;  %v735_v34 = vld [vmem:[#allocation7 + $0xf8] sm:$0xff]  ;;  %v703_v37 = vld [vmem:[#allocation7] sm:$0xff] }
 0x18c   :  { %v1815_v35 = vpack.c.bf16 %v735_v34, %v734_v33  ;;  %v1819_v39 = vpack.c.bf16 %v704_v38, %v703_v37  ;;  %v711_v33 = vld [vmem:[#allocation7 + $0x40] sm:$0xff]  ;;  %v712_v34 = vld [vmem:[#allocation7 + $0x48] sm:$0xff]  ;;  %v713_v37 = vld [vmem:[#allocation7 + $0x50] sm:$0xff] }
 0x18d   :  { %v522_v51 = vrot.slane %v521_v44, 1  ;;  %v530_v52 = vadd.f32 %v529_v48, %v528_v40  ;;  %v536_v53 = vrot.slane %v535_v49, 2  ;;  %v544_v55 = vadd.f32 %v543_v50, %v542_v42  ;;  %v714_v38 = vld [vmem:[#allocation7 + $0x58] sm:$0xff] }
 0x18f   :  { %v537_v56 = vadd.f32 %v536_v53, %v535_v49  ;;  %v531_v57 = vrot.slane %v530_v52, 1  ;;  %v545_v59 = vrot.slane %v544_v55, 2  ;;  %v523_v60 = vadd.f32 %v522_v51, %v521_v44 }
 0x191   :  { %v532_v61 = vadd.f32 %v531_v57, %v530_v52  ;;  %v538_v62 = vrot.slane %v537_v56, 1  ;;  %v546_v63 = vadd.f32 %v545_v59, %v544_v55  ;;  %v644_v55 = vsub.s32 1, %v2180_v32 }
 0x193   :  { %v539_v1 = vadd.f32 %v538_v62, %v537_v56  ;;  %v547_v2 = vrot.slane %v546_v63, 1  ;;  %v550_v3 = vsel %vm549_vm7, %v523_v60, %v532_v61 }
 0x195   :  { %v548_v4 = vadd.f32 %v547_v2, %v546_v63  ;;  %v552_v25 = vsel %vm551_vm8, %v550_v3, %v539_v1  ;;  %v650_v1 = vsub.s32 2, %v2180_v32 }
 0x197   :  { %v554_v28 = vsel %vm553_vm9, %v552_v25, %v548_v4 }
 0x198   :  { %1516 = vmatmul.mubr.f32.vlgmr.msra.gmra.mrb[0].mxu1 %v554_v28 }
 0x199   :  { %1790 = vmatpush3.bf16.msra.mxu1 %v1787_v7 }
 0x19a   :  { %1792 = vmatprep.subr.bf16.mxu1 %v1791_v11 }
 0x19d   :  { %1794 = vmatpush3.bf16.msra.mxu1 %v1791_v11 }
 0x19e   :  { %1796 = vmatprep.subr.bf16.mxu1 %v1795_v15 }
 0x1a1   :  { %1798 = vmatpush3.bf16.msra.mxu1 %v1795_v15  ;;  %v706_v15 = vld [vmem:[#allocation7 + $0x18] sm:$0xff] }
 0x1a2   :  { %1800 = vmatprep.subr.bf16.mxu1 %v1799_v19 }
 0x1a5   :  { %1802 = vmatpush3.bf16.msra.mxu1 %v1799_v19 }
 0x1a6   :  { %1804 = vmatprep.subr.bf16.mxu1 %v1803_v0 }
 0x1a9   :  { %1806 = vmatpush3.bf16.msra.mxu1 %v1803_v0  ;;  %v708_v0 = vld [vmem:[#allocation7 + $0x28] sm:$0xff] }
 0x1aa   :  { %1808 = vmatprep.subr.bf16.mxu1 %v1807_v26 }
 0x1ad   :  { %1810 = vmatpush3.bf16.msra.mxu1 %v1807_v26  ;;  %v1827_v26 = vpack.c.bf16 %v708_v0, %v707_v21 }
 0x1ae   :  { %1812 = vmatprep.subr.bf16.mxu1 %v1811_v30 }
 0x1b1   :  { %1814 = vmatpush3.bf16.msra.mxu1 %v1811_v30  ;;  %v1831_v30 = vpack.c.bf16 %v710_v29, %v709_v10 }
 0x1b2   :  { %1816 = vmatprep.subr.bf16.mxu1 %v1815_v35 }
 0x1b5   :  { %1818 = vmatpush3.bf16.msra.mxu1 %v1815_v35  ;;  %v1835_v35 = vpack.c.bf16 %v712_v34, %v711_v33 }
 0x1b6   :  { %1820 = vmatprep.subr.bf16.mxu1 %v1819_v39 }
 0x26b   :  { %v621_v40 = vpop.f32.mrb[0].mxu1 }
 0x26c   :  { %v625_v41 = vmul.f32 0.001953125, %v621_v40  ;;  %v1517_v42 = vpop.f32.mrb[1].mxu1  ;;  %v716_v40 = vld [vmem:[#allocation7 + $0x68] sm:$0xff] }
 0x26d   :  { %v717_v42 = vld [vmem:[#allocation7 + $0x70] sm:$0xff] }
 0x26e   :  { %v626_v44 = vmul.f32 %v625_v41, %v625_v41 }
 0x270   :  { %v628_v48 = vrot.slane %v626_v44, 7  ;;  %v718_v44 = vld [vmem:[#allocation7 + $0x78] sm:$0xff] }
 0x272   :  { %v630_v49 = vsub.f32 %v625_v41, %v628_v48  ;;  %v1847_v48 = vpack.c.bf16 %v718_v44, %v717_v42 }
 0x274   :  { %v631_v50 = vadd.f32 1e-05, %v630_v49  ;;  %v907_v49 = vld [vmem:[#allocation7 + $0x100] sm:$0xff] }
 0x276   :  { %1933 = vrsqrt.f32 %v631_v50  ;;  %v908_v50 = vld [vmem:[#allocation7 + $0x108] sm:$0xff] }
 0x280   :  { %v1934_v51 = vpop.eup %1933 }
 0x281   :  { %v633_v52 = vmul.f32 %v1934_v51, %v2268_v18  ;;  %v655_v53 = vrot.slane %v1934_v51, 2 }
 0x283   :  { %v635_v56 = vrot.slane %v633_v52, 1  ;;  %v657_v57 = vmul.f32 %v655_v53, %v2268_v18  ;;  %v645_v61 = vrot.slane %v633_v52, %v644_v55  ;;  %v1851_v53 = vpack.c.bf16 %v908_v50, %v907_v49 }
 0x285   :  { %v637_v59 = vmul.f32 %v635_v56, %v625_v41  ;;  %v659_v60 = vrot.slane %v657_v57, 7  ;;  %v666_v2 = vrot.slane %v657_v57, %v644_v55  ;;  %v646_v25 = vmul.f32 %v645_v61, %v2273_v22  ;;  %v909_v55 = vld [vmem:[#allocation7 + $0x110] sm:$0xff]  ;;  %v910_v56 = vld [vmem:[#allocation7 + $0x118] sm:$0xff] }
 0x286   :  { %v647_v28 = vmul.f32 %v645_v61, %v2271_v46  ;;  %v1823_v22 = vpack.c.bf16 %v706_v15, %v705_v14  ;;  %v919_v14 = vld [vmem:[#allocation7 + $0x160] sm:$0xff]  ;;  %v920_v15 = vld [vmem:[#allocation7 + $0x168] sm:$0xff] }
 0x287   :  { %v639_v62 = vrot.slane %v637_v59, 6  ;;  %v661_v63 = vmul.f32 %v659_v60, %v625_v41  ;;  %v667_v6 = vmul.f32 %v666_v2, %v2283_v31  ;;  %v668_v8 = vmul.f32 %v666_v2, %v2281_v27 }
 0x288   :  { %v1855_v59 = vpack.c.bf16 %v910_v56, %v909_v55 }
 0x289   :  { %v641_v3 = vsub.f32 %v2268_v18, %v639_v62  ;;  %v662_v4 = vsub.f32 %v2268_v18, %v661_v63  ;;  %v911_v62 = vld [vmem:[#allocation7 + $0x120] sm:$0xff]  ;;  %v912_v63 = vld [vmem:[#allocation7 + $0x128] sm:$0xff] }
 0x28b   :  { %v651_v5 = vrot.slane %v641_v3, %v650_v1  ;;  %v672_v7 = vrot.slane %v662_v4, %v650_v1  ;;  %v1859_v3 = vpack.c.bf16 %v912_v63, %v911_v62 }
 0x28d   :  { %v652_v9 = vadd.f32 %v651_v5, %v646_v25  ;;  %v653_v11 = vadd.f32 %v651_v5, %v647_v28  ;;  %v673_v12 = vadd.f32 %v672_v7, %v667_v6  ;;  %v674_v16 = vadd.f32 %v672_v7, %v668_v8  ;;  %v913_v25 = vld [vmem:[#allocation7 + $0x130] sm:$0xff]  ;;  %v914_v28 = vld [vmem:[#allocation7 + $0x138] sm:$0xff]  ;;  %v915_v6 = vld [vmem:[#allocation7 + $0x140] sm:$0xff] }
 0x28e   :  { %v1863_v5 = vpack.c.bf16 %v914_v28, %v913_v25  ;;  %v916_v7 = vld [vmem:[#allocation7 + $0x148] sm:$0xff] }
 0x28f   :  { %v2304_v17 = vmax.f32 %v652_v9, 0.0  ;;  %v2306_v19 = vmax.f32 %v653_v11, 0.0  ;;  %v2308_v20 = vmax.f32 %v674_v16, 0.0  ;;  %v2312_v31 = vmax.f32 %v673_v12, 0.0  ;;  %v917_v9 = vld [vmem:[#allocation7 + $0x150] sm:$0xff]  ;;  %v918_v11 = vld [vmem:[#allocation7 + $0x158] sm:$0xff] }
 0x290   :  { %v1867_v8 = vpack.c.bf16 %v916_v7, %v915_v6  ;;  %v1871_v12 = vpack.c.bf16 %v918_v11, %v917_v9  ;;  %v1875_v16 = vpack.c.bf16 %v920_v15, %v919_v14 }
 0x291   :  { %v679_v46 = vrot.slane %v2304_v17, 7  ;;  %1550 = vmatprep.mubr.f32.mxu1 %v2304_v17  ;;  %v682_v27 = vrot.slane %v2308_v20, 7  ;;  %v681_v51 = vrot.slane %v2312_v31, 7  ;;  %v680_v52 = vrot.slane %v2306_v19, 7 }
 0x292   :  { %1551 = vmatmul.mubr.f32.vlgmr.msra.gmra.mrb[2].mxu1 %v2306_v19  ;;  %v691_v1 = vrot.slane %v2304_v17, 1  ;;  %v692_v2 = vrot.slane %v2306_v19, 1  ;;  %v921_v17 = vld [vmem:[#allocation7 + $0x170] sm:$0xff]  ;;  %v922_v19 = vld [vmem:[#allocation7 + $0x178] sm:$0xff]  ;;  %v694_v21 = vrot.slane %v2308_v20, 1 }
 0x293   :  { %1822 = vmatpush3.bf16.msra.mxu1 %v1819_v39  ;;  %1553 = vmatprep.mubr.f32.mxu1 %v2312_v31  ;;  %v686_v23 = vsel %vm178_vm1, %v682_v27, %v679_v46  ;;  %v1839_v39 = vpack.c.bf16 %v714_v38, %v713_v37  ;;  %v684_v57 = vsel %vm178_vm1, %v680_v52, %v681_v51 }
 0x294   :  { %1824 = vmatprep.subr.bf16.mxu1 %v1823_v22  ;;  %v687_v24 = vmul.f32 %v2195_v47, %v686_v23  ;;  %v715_v47 = vld [vmem:[#allocation7 + $0x60] sm:$0xff]  ;;  %v685_v60 = vsel %vm178_vm1, %v679_v46, %v680_v52  ;;  %v689_v61 = vmul.f32 %v2211_v13, %v684_v57  ;;  %v683_v4 = vsel %vm178_vm1, %v681_v51, %v682_v27 }
 0x295   :  { %v1843_v41 = vpack.c.bf16 %v716_v40, %v715_v47  ;;  %v697_v13 = vsel %vm191_vm3, %v691_v1, %v692_v2  ;;  %v693_v46 = vrot.slane %v2312_v31, 1  ;;  %v698_v23 = vsel %vm191_vm3, %v694_v21, %v691_v1 }
 0x296   :  { %1554 = vmatmul.mubr.f32.gmra.mrb[4].mxu1 %v2308_v20  ;;  %v702_v31 = vmul.f32 %v2240_v58, %v698_v23 }
 0x297   :  { %1826 = vmatpush3.bf16.msra.mxu1 %v1823_v22  ;;  %1588 = vmatprep.mubr.f32.mxu1 %v687_v24  ;;  %v1879_v22 = vpack.c.bf16 %v922_v19, %v921_v17  ;;  %v696_v27 = vsel %vm191_vm3, %v692_v2, %v693_v46  ;;  %v695_v24 = vsel %vm191_vm3, %v693_v46, %v694_v21 }
 0x298   :  { %1828 = vmatprep.subr.bf16.mxu1 %v1827_v26  ;;  %v700_v0 = vmul.f32 %v2233_v54, %v696_v27 }
 0x29b   :  { %1830 = vmatpush3.bf16.msra.mxu1 %v1827_v26  ;;  %v1014_v26 = vsub.s32 3, %v2180_v32 }
 0x29c   :  { %1832 = vmatprep.subr.bf16.mxu1 %v1831_v30 }
 0x29d   :  { %v1015_v10 = vrot.slane %v2268_v18, %v1014_v26 }
 0x29f   :  { %1834 = vmatpush3.bf16.msra.mxu1 %v1831_v30 }
 0x2a0   :  { %1836 = vmatprep.subr.bf16.mxu1 %v1835_v35 }
 0x2a3   :  { %1838 = vmatpush3.bf16.msra.mxu1 %v1835_v35 }
 0x2a4   :  { %1840 = vmatprep.subr.bf16.mxu1 %v1839_v39 }
 0x2a7   :  { %1842 = vmatpush3.bf16.msra.mxu1 %v1839_v39 }
 0x2a8   :  { %1844 = vmatprep.subr.bf16.mxu1 %v1843_v41 }
 0x2ab   :  { %1846 = vmatpush3.bf16.msra.mxu1 %v1843_v41 }
 0x2ac   :  { %1848 = vmatprep.subr.bf16.mxu1 %v1847_v48 }
 0x2af   :  { %1850 = vmatpush3.bf16.msra.mxu1 %v1847_v48 }
 0x2b0   :  { %1852 = vmatprep.subr.bf16.mxu1 %v1851_v53 }
 0x2b2   :  { %1589 = vmatmul.mubr.f32.vlgmr.msra.gmra.mrb[2].mxu1 %v685_v60 }
 0x2b3   :  { %1591 = vmatprep.mubr.f32.mxu1 %v689_v61  ;;  %1854 = vmatpush3.bf16.msra.mxu1 %v1851_v53 }
 0x2b4   :  { %1856 = vmatprep.subr.bf16.mxu1 %v1855_v59 }
 0x2b6   :  { %1592 = vmatmul.mubr.f32.gmra.mrb[4].mxu1 %v683_v4 }
 0x2b7   :  { %1858 = vmatpush3.bf16.msra.mxu1 %v1855_v59  ;;  %1626 = vmatprep.mubr.f32.mxu1 %v697_v13 }
 0x2b8   :  { %1860 = vmatprep.subr.bf16.mxu1 %v1859_v3 }
 0x2bb   :  { %1862 = vmatpush3.bf16.msra.mxu1 %v1859_v3 }
 0x2bc   :  { %1864 = vmatprep.subr.bf16.mxu1 %v1863_v5 }
 0x2bf   :  { %1866 = vmatpush3.bf16.msra.mxu1 %v1863_v5 }
 0x2c0   :  { %1868 = vmatprep.subr.bf16.mxu1 %v1867_v8 }
 0x2c3   :  { %1870 = vmatpush3.bf16.msra.mxu1 %v1867_v8 }
 0x2c4   :  { %1872 = vmatprep.subr.bf16.mxu1 %v1871_v12 }
 0x2c7   :  { %1874 = vmatpush3.bf16.msra.mxu1 %v1871_v12 }
 0x2c8   :  { %1876 = vmatprep.subr.bf16.mxu1 %v1875_v16 }
 0x2cb   :  { %1878 = vmatpush3.bf16.msra.mxu1 %v1875_v16 }
 0x2cc   :  { %1880 = vmatprep.subr.bf16.mxu1 %v1879_v22 }
 0x2cf   :  { %1882 = vmatpush3.bf16.msra.mxu1 %v1879_v22 }
 0x2d2   :  { %1627 = vmatmul.mubr.f32.vlgmr.msra.gmra.mrb[2].mxu1 %v700_v0 }
 0x2d3   :  { %1629 = vmatprep.mubr.f32.mxu1 %v695_v24  ;;  %v1147_v24 = vsub.s32 4, %v2180_v32 }
 0x2d6   :  { %1630 = vmatmul.mubr.f32.gmra.mrb[4].mxu1 %v702_v31 }
 0x3a5   :  { %v1628_v29 = vpop.f32.mrb[2].mxu1 }
 0x3a6   :  { %v2346_v20 = vadd.f32 %v1628_v29, %v1015_v10  ;;  %v989_v30 = vpop.f32.mrb[3].mxu1 }
 0x3a7   :  { %v2348_v54 = vadd.f32 %v1015_v10, %v989_v30 }
 0x3a8   :  { %v1028_v33 = vmul.f32 %v2346_v20, %v2346_v20 }
 0x3a9   :  { %v1020_v34 = vadd.f32 %v2346_v20, %v2348_v54  ;;  %v1027_v58 = vmul.f32 %v2348_v54, %v2348_v54  ;;  %v1631_v35 = vpop.f32.mrb[4].mxu1 }
 0x3aa   :  { %v2356_v37 = vadd.f32 %v1631_v35, %v1015_v10  ;;  %v999_v38 = vpop.f32.mrb[5].mxu1 }
 0x3ab   :  { %v1021_v39 = vrot.slane %v1020_v34, 4  ;;  %v1029_v47 = vadd.f32 %v1028_v33, %v1027_v58  ;;  %v1018_v40 = vadd.f32 %v1015_v10, %v999_v38 }
 0x3ac   :  { %v1044_v41 = vmul.f32 %v2356_v37, %v2356_v37 }
 0x3ad   :  { %v1022_v42 = vadd.f32 %v1021_v39, %v1020_v34  ;;  %v1030_v44 = vrot.slane %v1029_v47, 4  ;;  %v1036_v48 = vadd.f32 %v2356_v37, %v1018_v40  ;;  %v1043_v49 = vmul.f32 %v1018_v40, %v1018_v40 }
 0x3ae   :  { %v1153_v34 = vsub.s32 5, %v2180_v32  ;;  %v1937_v32 = vld [vmem:[#allocation2] sm:$0xff] }
 0x3af   :  { %v1023_v50 = vrot.slane %v1022_v42, 2  ;;  %v1031_v51 = vadd.f32 %v1030_v44, %v1029_v47  ;;  %v1037_v52 = vrot.slane %v1036_v48, 4  ;;  %v1045_v53 = vadd.f32 %v1044_v41, %v1043_v49 }
 0x3b1   :  { %v1024_v55 = vadd.f32 %v1023_v50, %v1022_v42  ;;  %v1032_v56 = vrot.slane %v1031_v51, 2  ;;  %v1038_v57 = vadd.f32 %v1037_v52, %v1036_v48  ;;  %v1046_v59 = vrot.slane %v1045_v53, 4 }
 0x3b3   :  { %v1025_v60 = vrot.slane %v1024_v55, 1  ;;  %v1033_v61 = vadd.f32 %v1032_v56, %v1031_v51  ;;  %v1039_v62 = vrot.slane %v1038_v57, 2  ;;  %v1047_v63 = vadd.f32 %v1046_v59, %v1045_v53 }
 0x3b5   :  { %v1034_v1 = vrot.slane %v1033_v61, 1  ;;  %v1040_v2 = vadd.f32 %v1039_v62, %v1038_v57  ;;  %v1048_v3 = vrot.slane %v1047_v63, 2  ;;  %v1026_v4 = vadd.f32 %v1025_v60, %v1024_v55 }
 0x3b7   :  { %v1035_v25 = vadd.f32 %v1034_v1, %v1033_v61  ;;  %v1041_v28 = vrot.slane %v1040_v2, 1  ;;  %v1049_v13 = vadd.f32 %v1048_v3, %v1047_v63 }
 0x3b9   :  { %v1042_v5 = vadd.f32 %v1041_v28, %v1040_v2  ;;  %v1050_v6 = vrot.slane %v1049_v13, 1  ;;  %v1052_v7 = vsel %vm549_vm7, %v1026_v4, %v1035_v25 }
 0x3bb   :  { %v1051_v8 = vadd.f32 %v1050_v6, %v1049_v13  ;;  %v1053_v9 = vsel %vm551_vm8, %v1052_v7, %v1042_v5 }
 0x3bd   :  { %v1054_v11 = vsel %vm553_vm9, %v1053_v9, %v1051_v8 }
 0x3be   :  { %1665 = vmatmul.mubr.f32.vlgmr.msra.gmra.mrb[4].mxu0 %v1054_v11 }
 0x491   :  { %v1121_v12 = vpop.f32.mrb[4].mxu0 }
 0x492   :  { %v1125_v14 = vmul.f32 0.001953125, %v1121_v12  ;;  %v1666_v15 = vpop.f32.mrb[5].mxu0 }
 0x494   :  { %v1126_v16 = vmul.f32 %v1125_v14, %v1125_v14 }
 0x496   :  { %v1128_v17 = vrot.slane %v1126_v16, 7 }
 0x498   :  { %v1130_v19 = vsub.f32 %v1125_v14, %v1128_v17 }
 0x49a   :  { %v1131_v22 = vadd.f32 1e-05, %v1130_v19 }
 0x49c   :  { %1935 = vrsqrt.f32 %v1131_v22 }
 0x4a6   :  { %v1936_v46 = vpop.eup %1935 }
 0x4a7   :  { %v1134_v27 = vrot.slane %v1936_v46, 5  ;;  %v1157_v21 = vrot.slane %v1936_v46, 7 }
 0x4a9   :  { %v1136_v0 = vmul.f32 %v1134_v27, %v2268_v18  ;;  %v1159_v23 = vmul.f32 %v1157_v21, %v2268_v18 }
 0x4ab   :  { %v1138_v31 = vrot.slane %v1136_v0, 4  ;;  %v1161_v26 = vrot.slane %v1159_v23, 2  ;;  %v1148_v30 = vrot.slane %v1136_v0, %v1147_v24  ;;  %v1171_v35 = vrot.slane %v1159_v23, %v1147_v24 }
 0x4ad   :  { %v1140_v10 = vmul.f32 %v1138_v31, %v1125_v14  ;;  %v1163_v29 = vmul.f32 %v1161_v26, %v1125_v14  ;;  %v1149_v47 = vmul.f32 %v1148_v30, %v2348_v54  ;;  %v1150_v41 = vmul.f32 %v1148_v30, %v2346_v20 }
 0x4ae   :  { %v1172_v48 = vmul.f32 %v1171_v35, %v1018_v40  ;;  %v1173_v49 = vmul.f32 %v1171_v35, %v2356_v37 }
 0x4af   :  { %v1142_v33 = vrot.slane %v1140_v10, 3  ;;  %v1165_v58 = vrot.slane %v1163_v29, 5 }
 0x4b1   :  { %v1144_v38 = vsub.f32 %v2268_v18, %v1142_v33  ;;  %v1167_v39 = vsub.f32 %v2268_v18, %v1165_v58 }
 0x4b3   :  { %v1154_v42 = vrot.slane %v1144_v38, %v1153_v34  ;;  %v1177_v44 = vrot.slane %v1167_v39, %v1153_v34 }
 0x4b5   :  { %v1155_v50 = vadd.f32 %v1154_v42, %v1149_v47  ;;  %v1156_v51 = vadd.f32 %v1154_v42, %v1150_v41  ;;  %v1178_v52 = vadd.f32 %v1177_v44, %v1172_v48  ;;  %v1179_v53 = vadd.f32 %v1177_v44, %v1173_v49 }
 0x4b7   :  { %v1180_v55 = vadd.f32 %v1937_v32, %v1155_v50  ;;  %v1181_v56 = vadd.f32 %v1156_v51, %v2190_v43  ;;  %v1182_v18 = vadd.f32 %v1178_v52, %v2192_v45  ;;  %v1183_v54 = vadd.f32 %v1179_v53, %v2184_v36 }
 0x4b9   :  { %v1184_v20 = vmax.f32 %v1180_v55, 0.0  ;;  %v1185_v57 = vmax.f32 %v1181_v56, 0.0  ;;  %v1186_v59 = vmax.f32 %v1182_v18, 0.0  ;;  %v1187_v40 = vmax.f32 %v1183_v54, 0.0 }
 0x4bb   :  { %1188 = vst [vmem:[#allocation10] sm:$0xff] %v1184_v20  ;;  %1189 = vst [vmem:[#allocation10 + $0x8] sm:$0xff] %v1185_v57 }
 0x4bc   :  { %1190 = vst [vmem:[#allocation10 + $0x10] sm:$0xff] %v1186_v59  ;;  %1191 = vst [vmem:[#allocation10 + $0x18] sm:$0xff] %v1187_v40 }
 0x4bd   :  { %2037 = shalt.err (!%p2034_p8)
}
 0x4be   :  { %s2038_s22 = scalar_lea.hbm %s2396_s5, 512 }
 0x4bf   :  { %p2039_p9 = scmp.ne.s32.totalorder %s2396_s5, %s2038_s22  ;;  %p2042_p10 = scmp.lt.u32.totalorder %s2038_s22, %s2396_s5 }
 0x4c1   :  { %p2044_p11 = pnand %p2042_p10, %p2039_p9 }
 0x4c3   :  { %2047 = shalt.err (!%p2044_p11)
}
 0x4c4   :  { %1203 = dma.vmem_to_hbm [thread:$0]  %s1198_s17, 512, %s2396_s5, [#allocation4], %s2058_s30, %s2058_s30, %s2059_s6  }
 0x4c5   :  { %2054 = dma.done.wait [#allocation4], 512  }
 0x4c6   :  { %2055 = vsyncadd [#allocation4], 4294966784 }
 0x4c7   :  { %1207 = vsyncpa [#allocation3], 1 }
 0x4c8   :  { %1208 = vsyncpa [#allocation6], 1 }
 0x4c9   :  { %1209 = vsyncpa [#allocation9], 1 }
 0x4ca   :  { %1210 = vsyncpa [#allocation4], 1 }

</bundles_post_ra>
